<compile_context>
chip_gen: v5e
topology: v5e:2x2
jax: 0.10.0
libtpu: 0.0.40
codegen_flags: <defaults>
</compile_context>

<pallas_src>
import functools

import jax
import jax.numpy as jnp
from jax.experimental import pallas as pl
from jax.experimental.pallas import tpu as pltpu

_MiB = 1024 * 1024


def _round_up(x, m):
    return (x + m - 1) // m * m


def _sublane_rows(dtype):
    # Rows per packed sublane tile: f32 -> 8, bf16/f16 -> 16, int8/fp8 -> 32.
    return 8 * max(1, 4 // jnp.dtype(dtype).itemsize)


def classifier_kernel(x_ref, w_ref, b_ref, logits_ref, probs_ref):
    # x: (TB, D) native dtype   w: (D, L) native dtype   b: (1, L) f32
    logits = jnp.dot(x_ref[...], w_ref[...], preferred_element_type=jnp.float32)
    logits = logits + b_ref[...]
    logits_ref[...] = logits.astype(logits_ref.dtype)

    # Numerically-stable softmax over the last dim, exact f32 division
    # (kernel is HBM-bound; the approx reciprocal bought nothing and cost accuracy).
    m = jnp.max(logits, axis=-1, keepdims=True)
    e = jnp.exp(logits - m)
    denom = jnp.sum(e, axis=-1, keepdims=True)
    probs_ref[...] = (e / denom).astype(probs_ref.dtype)


@functools.partial(jax.jit, static_argnames=("tile_b",))
def classifier_forward(x, weight_t, bias, *, tile_b=512):
    """Forward of the PyTorch Classifier (dropout in eval mode = identity).

    x: (B, D);  weight_t: (D, L) (PyTorch nn.Linear weight transposed);
    bias: (L,).  Returns (logits, softmax(logits, axis=-1)), both (B, L).
    """
    B, D = x.shape
    L = weight_t.shape[1]
    out_dtype = x.dtype

    # Batch tile: dtype-aligned sublanes, >= 2 grid steps when B allows (v7x 2 TCs).
    sub = _sublane_rows(x.dtype)
    TB = min(tile_b, _round_up(B, sub))
    while B > sub and TB > sub and pl.cdiv(B, TB) < 2:
        TB = _round_up(TB // 2, sub)
    grid = (pl.cdiv(B, TB),)  # partial final block is masked by Pallas; no padding

    bias2d = bias.reshape(1, L).astype(jnp.float32)

    in_itemsize = jnp.dtype(x.dtype).itemsize
    out_itemsize = jnp.dtype(out_dtype).itemsize
    w_bytes = D * L * jnp.dtype(weight_t.dtype).itemsize

    # Resident weight: single-buffer when large (constant index_map -> fetched once),
    # so the footprint stays inside v7x's 64 MiB VMEM.
    w_single_buffer = w_bytes > 8 * _MiB
    w_kwargs = {"pipeline_mode": pl.Buffered(1)} if w_single_buffer else {}
    w_buffers = 1 if w_single_buffer else 2

    vmem_needed = (
        2 * TB * D * in_itemsize            # streamed x tile (double-buffered)
        + w_buffers * w_bytes               # resident weight
        + 2 * L * 4                         # bias
        + 2 * 2 * TB * L * out_itemsize     # logits + probs tiles (double-buffered)
    )
    assert vmem_needed <= 56 * _MiB, (
        "Resident weight + tiles exceed the v7x VMEM budget; a label-tiling grid "
        "axis with an online softmax is required for this head size.")

    compiler_kwargs = dict(dimension_semantics=("parallel",))
    if vmem_needed > 32 * _MiB:
        compiler_kwargs["vmem_limit_bytes"] = int(min(vmem_needed + 8 * _MiB, 100 * _MiB))

    cost = pl.CostEstimate(
        flops=2 * B * D * L,
        transcendentals=B * L,
        bytes_accessed=(B * D * in_itemsize + w_bytes + L * 4
                        + 2 * B * L * out_itemsize),
    )

    logits, probs = pl.pallas_call(
        classifier_kernel,
        grid=grid,
        out_shape=(
            jax.ShapeDtypeStruct((B, L), out_dtype),
            jax.ShapeDtypeStruct((B, L), out_dtype),
        ),
        in_specs=[
            pl.BlockSpec((TB, D), lambda i: (i, 0)),              # streamed x tiles
            pl.BlockSpec((D, L), lambda i: (0, 0), **w_kwargs),   # resident weight
            pl.BlockSpec((1, L), lambda i: (0, 0)),               # resident bias
        ],
        out_specs=(
            pl.BlockSpec((TB, L), lambda i: (i, 0)),
            pl.BlockSpec((TB, L), lambda i: (i, 0)),
        ),
        compiler_params=pltpu.CompilerParams(**compiler_kwargs),
        cost_estimate=cost,
    )(x, weight_t, bias2d)

    return logits, probs


if __name__ == "__main__":
    # Small shapes consistent with the module's forward.
    embedding_dim = 32
    num_labels = 8
    batch = 8

    key = jax.random.PRNGKey(0)
    k_x, k_w, k_b = jax.random.split(key, 3)

    # Deterministic "nn.Linear"-style init: U(-1/sqrt(D), 1/sqrt(D)).
    bound = 1.0 / (embedding_dim ** 0.5)
    # PyTorch stores weight as (num_labels, embedding_dim); keep it pre-transposed.
    weight_t = jax.random.uniform(
        k_w, (embedding_dim, num_labels), jnp.float32, -bound, bound)
    bias = jax.random.uniform(k_b, (num_labels,), jnp.float32, -bound, bound)

    x = jax.random.normal(k_x, (batch, embedding_dim), jnp.float32)

    logits, probs = classifier_forward(x, weight_t, bias)
    jax.block_until_ready((logits, probs))

    # Sanity check against plain-JAX reference (dropout eval mode = identity).
    ref_logits = x @ weight_t + bias
    ref_probs = jax.nn.softmax(ref_logits, axis=-1)
    assert logits.shape == (batch, num_labels)
    assert probs.shape == (batch, num_labels)
    assert jnp.allclose(logits, ref_logits, atol=1e-5, rtol=1e-5)
    assert jnp.allclose(probs, ref_probs, atol=1e-5, rtol=1e-5)
    assert jnp.allclose(jnp.sum(probs, axis=-1), 1.0, atol=1e-5)

    print("KERNEL_OK")
</pallas_src>

<mosaic_0001>
module attributes {stable_mosaic.version = 11 : i64} {
  func.func @classifier_kernel(%arg0: i32, %arg1: memref<8x32xf32, #tpu.memory_space<vmem>>, %arg2: memref<32x8xf32, #tpu.memory_space<vmem>>, %arg3: memref<1x8xf32, #tpu.memory_space<vmem>>, %arg4: memref<8x8xf32, #tpu.memory_space<vmem>>, %arg5: memref<8x8xf32, #tpu.memory_space<vmem>>) attributes {dimension_semantics = [#tpu.dimension_semantics<parallel>], iteration_bounds = array<i64: 1>, scalar_prefetch = 0 : i64, scratch_operands = 0 : i64, tpu.core_type = #tpu.core_type<tc>, window_params = [{transform_indices = @transform_0, window_bounds = array<i64: 8, 32>}, {pipeline_mode = #tpu.pipeline_mode<synchronous>, transform_indices = @transform_1, window_bounds = array<i64: 32, 8>}, {pipeline_mode = #tpu.pipeline_mode<synchronous>, transform_indices = @transform_2, window_bounds = array<i64: 1, 8>}, {transform_indices = @transform_3, window_bounds = array<i64: 8, 8>}, {transform_indices = @transform_4, window_bounds = array<i64: 8, 8>}]} {
    %c0 = arith.constant 0 : index
    %c0_0 = arith.constant 0 : index
    %0 = vector.load %arg1[%c0, %c0_0] : memref<8x32xf32, #tpu.memory_space<vmem>>, vector<8x32xf32>
    %c0_1 = arith.constant 0 : index
    %c0_2 = arith.constant 0 : index
    %1 = vector.load %arg2[%c0_1, %c0_2] : memref<32x8xf32, #tpu.memory_space<vmem>>, vector<32x8xf32>
    %cst = arith.constant dense<0.000000e+00> : vector<8x8xf32>
    %2 = tpu.matmul %0, %1, %cst {dimension_numbers = #tpu.dot_dimension_numbers<[1], [0], [0], [1], [0, 0, 1, 1], [], []>} : vector<8x32xf32>, vector<32x8xf32>, vector<8x8xf32> -> vector<8x8xf32>
    %c0_3 = arith.constant 0 : index
    %c0_4 = arith.constant 0 : index
    %3 = vector.load %arg3[%c0_3, %c0_4] : memref<1x8xf32, #tpu.memory_space<vmem>>, vector<1x8xf32>
    %4 = vector.broadcast %3 : vector<1x8xf32> to vector<8x8xf32>
    %5 = arith.addf %2, %4 : vector<8x8xf32>
    %c0_5 = arith.constant 0 : index
    %c0_6 = arith.constant 0 : index
    %6 = vector.load %arg4[%c0_5, %c0_6] : memref<8x8xf32, #tpu.memory_space<vmem>>, vector<8x8xf32>
    tpu.vector_store %arg4[%c0_5, %c0_6], %5 {strides = array<i32>} : memref<8x8xf32, #tpu.memory_space<vmem>>, vector<8x8xf32>,
    %cst_7 = arith.constant dense<0xFF800000> : vector<8xf32>
    %7 = vector.multi_reduction <maximumf>, %5, %cst_7 [1] : vector<8x8xf32> to vector<8xf32>
    %8 = vector.shape_cast %7 : vector<8xf32> to vector<8x1xf32>
    %9 = vector.broadcast %8 : vector<8x1xf32> to vector<8x8xf32>
    %10 = arith.subf %5, %9 : vector<8x8xf32>
    %11 = math.exp %10 : vector<8x8xf32>
    %cst_8 = arith.constant dense<0.000000e+00> : vector<8xf32>
    %12 = vector.multi_reduction <add>, %11, %cst_8 [1] : vector<8x8xf32> to vector<8xf32>
    %13 = vector.shape_cast %12 : vector<8xf32> to vector<8x1xf32>
    %14 = vector.broadcast %13 : vector<8x1xf32> to vector<8x8xf32>
    %15 = arith.divf %11, %14 : vector<8x8xf32>
    %c0_9 = arith.constant 0 : index
    %c0_10 = arith.constant 0 : index
    %16 = vector.load %arg5[%c0_9, %c0_10] : memref<8x8xf32, #tpu.memory_space<vmem>>, vector<8x8xf32>
    tpu.vector_store %arg5[%c0_9, %c0_10], %15 {strides = array<i32>} : memref<8x8xf32, #tpu.memory_space<vmem>>, vector<8x8xf32>,
    return
  }
  func.func @transform_0(%arg0: i32) -> (i32, i32) {
    %c0_i32 = arith.constant 0 : i32
    %c0_i32_0 = arith.constant 0 : i32
    return %arg0, %c0_i32 : i32, i32
  }
  func.func @transform_1(%arg0: i32) -> (i32, i32) {
    %c0_i32 = arith.constant 0 : i32
    %c0_i32_0 = arith.constant 0 : i32
    %c0_i32_1 = arith.constant 0 : i32
    return %c0_i32, %c0_i32_0 : i32, i32
  }
  func.func @transform_2(%arg0: i32) -> (i32, i32) {
    %c0_i32 = arith.constant 0 : i32
    %c0_i32_0 = arith.constant 0 : i32
    %c0_i32_1 = arith.constant 0 : i32
    return %c0_i32, %c0_i32_0 : i32, i32
  }
  func.func @transform_3(%arg0: i32) -> (i32, i32) {
    %c0_i32 = arith.constant 0 : i32
    %c0_i32_0 = arith.constant 0 : i32
    return %arg0, %c0_i32 : i32, i32
  }
  func.func @transform_4(%arg0: i32) -> (i32, i32) {
    %c0_i32 = arith.constant 0 : i32
    %c0_i32_0 = arith.constant 0 : i32
    return %arg0, %c0_i32 : i32, i32
  }
}

</mosaic_0001>

<bundles_post_ra>
// kernel: classifier_forward.1
= control target key start
LH: loop header
LB: loop body
LE: loop exit
PB: predicated region body
PF: predicated region fallthrough
CT: control target
= control target key end

     0   :  { %10 = vsyncpa [#allocation3], 0  ;;  %s225_s0 = inlined_call_operand.vmem [shape: f32[8,32], index: 0, kind: input, shape index: {}]   ;;  %s226_s1 = inlined_call_operand.vmem [shape: f32[32,8], index: 1, kind: input, shape index: {}]   ;;  %s227_s2 = inlined_call_operand.vmem [shape: f32[1,8], index: 2, kind: input, shape index: {}]   ;;  %s228_s3 = inlined_call_operand.hbm [shape: f32[8,8], index: 3, kind: output, shape index: {0}]   ;;  %s229_s4 = inlined_call_operand.hbm [shape: f32[8,8], index: 4, kind: output, shape index: {1}]  }
   0x1   :  { %v22_v0 = vld [vmem:[%s226_s1 + $0x18] sm:$0xff]  ;;  %v21_v1 = vld [vmem:[%s226_s1 + $0x10] sm:$0xff]  ;;  %v20_v2 = vld [vmem:[%s226_s1 + $0x8] sm:$0xff] }
   0x2   :  { %43 = vmatpush.msra.mxu0 %v22_v0 }
   0x3   :  { %11 = vsyncpa [#allocation5], 0  ;;  %v19_v3 = vld [vmem:[%s226_s1] sm:$0xff]  ;;  %vm27_vm0 = vcmask 261120   ;;  %vm51_vm1 = vcmask 64512   ;;  %s170_s27 = smov [#allocation2]  }
   0x4   :  { %44 = vmatpush.msra.mxu0 %v21_v1  ;;  %v18_v4 = vld [vmem:[%s225_s0] sm:$0xff]  ;;  %s83_s28 = sshll.u32 %s170_s27, 4  ;;  %s171_s29 = smov [#allocation4]   ;;  %s84_s28 = int_to_ptr.vmem [resolvable:$true] %s83_s28 }
   0x5   :  { %v113_v5 = vld [vmem:[%s227_s2] ss:$0 sm:$0xff]  ;;  %s85_s2 = sshll.u32 %s228_s3, 4  ;;  %s94_s3 = sshll.u32 %s171_s29, 4  ;;  %s86_s2 = int_to_ptr.hbm [resolvable:$true] %s85_s2  ;;  %s95_s3 = int_to_ptr.vmem [resolvable:$true] %s94_s3 }
   0x6   :  { %45 = vmatpush.msra.mxu0 %v20_v2  ;;  %s96_s6 = sshll.u32 %s229_s4, 4  ;;  %s97_s6 = int_to_ptr.hbm [resolvable:$true] %s96_s6 }
   0x8   :  { %46 = vmatpush.msra.mxu0 %v19_v3 }
   0x9   :  { %110 = vmatmul.msk.f32.vlgmr.msra.gmra.mxu0 %vm27_vm0, %v18_v4 }
  0x86   :  { %v48_v6 = vpop.f32.mrf.mxu0 }
  0x87   :  { %v49_v7 = vadd.f32 %v113_v5, %v48_v6 }
  0x89   :  { %v53_v8 = vsel %vm51_vm1, %v49_v7, -inf  ;;  %52 = vst.msk [vmem:[#allocation2] sm:$0xff] %vm51_vm1, %v49_v7 }
  0x8a   :  { %54 = vmax.xlane.f32.xlu0 %v53_v8  ;;  %88 = dma.vmem_to_hbm [thread:$0]  %s84_s28, 128, %s86_s2, [#allocation3]  }
  0xfd   :  { %v55_v9 = vpop.xlane.xlu0 %54 }
  0xfe   :  { %v56_v10 = vsub.f32 %v49_v7, %v55_v9 }
 0x100   :  { %v57_v11 = vmul.f32 1.442695, %v56_v10 }
 0x102   :  { %114 = vpow2.f32 %v57_v11 }
 0x108   :  { %v115_v12 = vpop.eup %114 }
 0x109   :  { %v59_v13 = vsel %vm51_vm1, %v115_v12, 0.0 }
 0x10a   :  { %60 = vadd.xlane.f32.xlu0 %v59_v13 }
 0x17d   :  { %v61_v14 = vpop.xlane.xlu0 %60 }
 0x17e   :  { %116 = vrcp.f32 %v61_v14  ;;  %v73_v18 = vand.u32 2147483648, %v61_v14  ;;  %v71_v20 = vand.u32 2147483647, %v61_v14  ;;  %vm67_vm3 = vweird.f32 %v61_v14 }
 0x180   :  { %v74_v22 = vor.u32 1.1754944e-38, %v73_v18  ;;  %vm72_vm5 = vcmp.eq.f32.partialorder %v71_v20, 8.507059e+37 }
 0x184   :  { %v117_v15 = vpop.eup %116 }
 0x185   :  { %v63_v16 = vmul.f32 %v117_v15, %v61_v14  ;;  %vm68_vm2 = vweird.f32 %v117_v15 }
 0x186   :  { %vm69_vm4 = vmor %vm67_vm3, %vm68_vm2 }
 0x187   :  { %v64_v17 = vsub.f32 1.0, %v63_v16 }
 0x189   :  { %v65_v19 = vmul.f32 %v117_v15, %v64_v17 }
 0x18b   :  { %v66_v21 = vadd.f32 %v117_v15, %v65_v19 }
 0x18d   :  { %v70_v23 = vsel %vm69_vm4, %v117_v15, %v66_v21 }
 0x18e   :  { %v75_v24 = vsel %vm72_vm5, %v74_v22, %v70_v23 }
 0x18f   :  { %v76_v25 = vmul.f32 %v115_v12, %v75_v24 }
 0x191   :  { %77 = vst.msk [vmem:[#allocation4] sm:$0xff] %vm51_vm1, %v76_v25 }
 0x192   :  { %99 = dma.vmem_to_hbm [thread:$0]  %s95_s3, 128, %s97_s6, [#allocation5]  }
 0x193   :  { %166 = dma.done.wait [#allocation3], 128  }
 0x194   :  { %167 = vsyncadd [#allocation3], 4294967168 }
 0x195   :  { %168 = dma.done.wait [#allocation5], 128  }
 0x196   :  { %169 = vsyncadd [#allocation5], 4294967168 }
 0x197   :  { %108 = vsyncpa [#allocation3], 1 }
 0x198   :  { %109 = vsyncpa [#allocation5], 1 }

</bundles_post_ra>
